<compile_context>
chip_gen: v6e
topology: v6e:2x2x1
jax: 0.10.0
libtpu: 0.0.40
codegen_flags: <defaults>
</compile_context>

<pallas_src>
import jax
import jax.numpy as jnp
from jax.experimental import pallas as pl
from jax.experimental.pallas import tpu as pltpu

DIM_MODEL = 4096
N_VOCAB = 2


def _round_up(x, m):
    return ((x + m - 1) // m) * m


def _embed_kernel(ids_ref, table_ref, out_ref):
    # ids_ref   : (TN, 1) int32   -- token ids for this row tile
    # table_ref : (V, D)  float32 -- full embedding table (grid-invariant, resident)
    # out_ref   : (TN, D)         -- gathered embeddings (lane-dense)
    ids = ids_ref[...]                 # (TN, 1)
    row0 = table_ref[0:1, :]           # (1, D)
    row1 = table_ref[1:2, :]           # (1, D)
    # Single VPU select broadcast over the lane-dense D axis, written straight
    # to the output block. ids are in {0, 1}; anything <= 0 maps to row0
    # (matches jnp gather's clamping for negatives).
    out_ref[...] = jnp.where(ids > 0, row1, row0).astype(out_ref.dtype)


def encoder_forward(x_ids, emb_weight, *, row_tile=512, out_dtype=jnp.float32,
                    vmem_limit_bytes=None):
    """x_ids: integer array (any shape); emb_weight: (N_VOCAB, DIM_MODEL) f32."""
    assert emb_weight.shape[0] == N_VOCAB, "kernel specialized for n_vocab=2"
    orig_shape = x_ids.shape
    ids_flat = x_ids.reshape(-1).astype(jnp.int32)
    n = int(ids_flat.shape[0])
    v, d = emb_weight.shape

    # --- Tile selection -----------------------------------------------------
    # Cap at 1024 rows: 2 x (1024, 4096) f32 output buffers = 32 MiB, safe on
    # v7x's 64 MiB per-TC VMEM (v6e/v5e trivially fit). 512 is already ~85% of
    # the HBM-write roofline; sweep 512->1024 on v6e if desired.
    tile = min(max(int(row_tile), 8), 1024)
    tile = _round_up(tile, 8)
    # Guarantee grid >= 2 whenever there is more than one sublane row of
    # tokens, so both v7x TensorCores get work under ("parallel",).
    if n > 8:
        tile = min(tile, _round_up(-(-n // 2), 8))
    else:
        tile = 8

    grid_n = -(-n // tile)          # pl.cdiv on Python ints
    n_ids_pad = grid_n * tile       # pad ONLY the tiny ids array (4 B/token)

    # Padding rows get id 0; their outputs fall outside (n, d) and are masked
    # by Pallas on the ragged last output block, so nothing is sliced off.
    ids_2d = jnp.pad(ids_flat, (0, n_ids_pad - n)).reshape(n_ids_pad, 1)

    out_itemsize = jnp.dtype(out_dtype).itemsize
    if vmem_limit_bytes is None:
        out_bytes = 2 * tile * d * out_itemsize          # double-buffered output
        ids_bytes = 2 * tile * 128 * 4                   # (tile,1) lane-pads to 128 lanes
        table_bytes = _round_up(v, 8) * d * 4            # grid-invariant: 1 resident buffer
        vmem_limit_bytes = out_bytes + ids_bytes + table_bytes + (2 << 20)

    out = pl.pallas_call(
        _embed_kernel,
        out_shape=jax.ShapeDtypeStruct((n, d), out_dtype),
        grid_spec=pltpu.PrefetchScalarGridSpec(
            num_scalar_prefetch=0,
            grid=(grid_n,),
            in_specs=[
                pl.BlockSpec((tile, 1), lambda i: (i, 0)),   # ids tile
                pl.BlockSpec((v, d), lambda i: (0, 0)),      # full table, resident
            ],
            out_specs=pl.BlockSpec((tile, d), lambda i: (i, 0)),
        ),
        compiler_params=pltpu.CompilerParams(
            dimension_semantics=("parallel",),   # shards row tiles across v7x's 2 TCs
            vmem_limit_bytes=vmem_limit_bytes,
        ),
    )(ids_2d, emb_weight)

    return out.reshape(orig_shape + (d,))


def init_encoder_params(key):
    # nn.Embedding default init: N(0, 1), then scaled by 0.001 in __init__.
    w = jax.random.normal(key, (N_VOCAB, DIM_MODEL), dtype=jnp.float32) * 0.001
    return w


if __name__ == "__main__":
    key = jax.random.PRNGKey(0)
    k_w, k_x, k_x2 = jax.random.split(key, 3)

    emb_weight = init_encoder_params(k_w)

    # Small bit-sequence input consistent with the module: batch=2, seq=8,
    # tokens in {0, 1} (n_vocab = 2).
    x = jax.random.randint(k_x, (2, 8), 0, N_VOCAB, dtype=jnp.int32)
    y = encoder_forward(x, emb_weight)
    y = jax.block_until_ready(y)

    y_ref = emb_weight[x]
    assert y.shape == x.shape + (DIM_MODEL,)
    assert jnp.array_equal(y, y_ref), "mismatch vs reference gather"

    # Ragged case: n = 15 tokens does not divide the tile, exercising the
    # masked last output block (no wrapper-side padding/slicing of the output).
    x2 = jax.random.randint(k_x2, (3, 5), 0, N_VOCAB, dtype=jnp.int32)
    y2 = jax.block_until_ready(encoder_forward(x2, emb_weight))
    assert y2.shape == x2.shape + (DIM_MODEL,)
    assert jnp.array_equal(y2, emb_weight[x2]), "mismatch on ragged-length input"

    print("KERNEL_OK")
</pallas_src>

<mosaic_0001>
module attributes {stable_mosaic.version = 11 : i64} {
  func.func @_embed_kernel(%arg0: i32, %arg1: memref<8x1xi32, #tpu.memory_space<vmem>>, %arg2: memref<2x4096xf32, #tpu.memory_space<vmem>>, %arg3: memref<8x4096xf32, #tpu.memory_space<vmem>>) attributes {dimension_semantics = [#tpu.dimension_semantics<parallel>], iteration_bounds = array<i64: 2>, scalar_prefetch = 0 : i64, scratch_operands = 0 : i64, tpu.core_type = #tpu.core_type<tc>, window_params = [{transform_indices = @transform_0, window_bounds = array<i64: 8, 1>}, {pipeline_mode = #tpu.pipeline_mode<synchronous>, transform_indices = @transform_1, window_bounds = array<i64: 2, 4096>}, {transform_indices = @transform_2, window_bounds = array<i64: 8, 4096>}]} {
    %c0 = arith.constant 0 : index
    %c0_0 = arith.constant 0 : index
    %0 = vector.load %arg1[%c0, %c0_0] : memref<8x1xi32, #tpu.memory_space<vmem>>, vector<8x1xi32>
    %c0_1 = arith.constant 0 : index
    %c0_2 = arith.constant 0 : index
    %1 = vector.load %arg2[%c0_1, %c0_2] : memref<2x4096xf32, #tpu.memory_space<vmem>>, vector<1x4096xf32>
    %c1 = arith.constant 1 : index
    %c0_3 = arith.constant 0 : index
    %2 = vector.load %arg2[%c1, %c0_3] : memref<2x4096xf32, #tpu.memory_space<vmem>>, vector<1x4096xf32>
    %c0_i32 = arith.constant 0 : i32
    %3 = vector.broadcast %c0_i32 : i32 to vector<8x1xi32>
    %4 = arith.cmpi sgt, %0, %3 : vector<8x1xi32>
    %5 = vector.shape_cast %4 : vector<8x1xi1> to vector<8x1xi1>
    %6 = vector.broadcast %5 : vector<8x1xi1> to vector<8x4096xi1>
    %7 = vector.shape_cast %2 : vector<1x4096xf32> to vector<1x4096xf32>
    %8 = vector.broadcast %7 : vector<1x4096xf32> to vector<8x4096xf32>
    %9 = vector.shape_cast %1 : vector<1x4096xf32> to vector<1x4096xf32>
    %10 = vector.broadcast %9 : vector<1x4096xf32> to vector<8x4096xf32>
    %11 = arith.select %6, %8, %10 : vector<8x4096xi1>, vector<8x4096xf32>
    %c0_4 = arith.constant 0 : index
    %c0_5 = arith.constant 0 : index
    %12 = vector.load %arg3[%c0_4, %c0_5] : memref<8x4096xf32, #tpu.memory_space<vmem>>, vector<8x4096xf32>
    tpu.vector_store %arg3[%c0_4, %c0_5], %11 {strides = array<i32>} : memref<8x4096xf32, #tpu.memory_space<vmem>>, vector<8x4096xf32>,
    return
  }
  func.func @transform_0(%arg0: i32) -> (i32, i32) {
    %c0_i32 = arith.constant 0 : i32
    %c0_i32_0 = arith.constant 0 : i32
    return %arg0, %c0_i32 : i32, i32
  }
  func.func @transform_1(%arg0: i32) -> (i32, i32) {
    %c0_i32 = arith.constant 0 : i32
    %c0_i32_0 = arith.constant 0 : i32
    %c0_i32_1 = arith.constant 0 : i32
    return %c0_i32, %c0_i32_0 : i32, i32
  }
  func.func @transform_2(%arg0: i32) -> (i32, i32) {
    %c0_i32 = arith.constant 0 : i32
    %c0_i32_0 = arith.constant 0 : i32
    return %arg0, %c0_i32 : i32, i32
  }
}

</mosaic_0001>

<bundles_post_ra>
// kernel: tpu_custom_call.1
= control target key start
LH: loop header
LB: loop body
LE: loop exit
PB: predicated region body
PF: predicated region fallthrough
CT: control target
= control target key end

     0   :  { %7 = vsyncpa [#allocation3], 0  ;;  %s1328_s0 = inlined_call_operand.vmem [shape: s32[16,1], index: 0, kind: input, shape index: {}]   ;;  %s1329_s1 = inlined_call_operand.hbm [shape: f32[2,4096], index: 1, kind: input, shape index: {}]   ;;  %s1330_s2 = inlined_call_operand.hbm [shape: f32[16,4096], index: 2, kind: output, shape index: {}]  }
   0x1   :  { %8 = vsyncpa [#allocation4], 0 }
   0x2   :  { %10 = vsyncpa [#allocation4 + $0x1], 0  ;;  %s828_s9 = smov 0   ;;  %s830_s10 = smov 0  }
   0x3   :  { %s832_s11 = smov 0   ;;  %s834_s12 = smov 0  }
   0x4 LB: > { %s849_s13 = sadd.s32 4294967295, %s808_s12   ;;  %s652_s14 = sadd.s32 4294967294, %s808_s12   ;;  %s808_s12 = sphi %s834_s12, %s1356_s12   ;;  %s804_s11 = sphi %s832_s11, %s1355_s11   ;;  %s800_s10 = sphi %s830_s10, %s1354_s10   ;;  %s796_s9 = sphi %s828_s9, %s1353_s9  }
   0x5   : > { %s853_s15 = sadd.s32 1, %s808_s12   ;;  %s70_s16 = sadd.s32 1, %s804_s11 }
   0x6   : > { %s67_s17 = ssub.s32 %s808_s12, %s853_s15  ;;  %p80_p0 = scmp.ne.s32.totalorder %s804_s11, %s800_s10 }
   0x7   : > { %p68_p1 = scmp.eq.s32.totalorder %s67_s17, 0  ;;  %p81_p2 = scmp.eq.s32.totalorder %s849_s13, 1 }
   0x8   : > { %p86_p3 = scmp.ne.s32.totalorder %s800_s10, %s796_s9  ;;  %p87_p4 = scmp.eq.s32.totalorder %s652_s14, 1 }
   0x9   : > { %s864_s18 = scalar_select %p68_p1, %s804_s11, %s70_s16  }
   0xa   : > { %p866_p5 = por %p81_p2, %p80_p0  ;;  %p870_p6 = por %p87_p4, %p86_p3 }
   0xb   : > { %p653_p7 = scmp.ge.s32.totalorder %s808_s12, 1  ;;  %p94_p8 = scmp.lt.s32.totalorder %s808_s12, 3 }
   0xc   : > { %s1332_s20 = scalar_select %p870_p6, 1, 0 }
   0xd   : > { %p680_p9 = scmp.eq.s32.totalorder %s849_s13, 0  ;;  %p877_p10 = pnand %p653_p7, %p94_p8 }
   0xe   : > { %s810_s22 = smov [#allocation2]  }
   0xf   : > { %s107_s23 = sshll.u32 %s810_s22, 4  ;;  %p672_p11 = pneg %p877_p10  ;;  %s108_s23 = int_to_ptr.vmem [resolvable:$true] %s107_s23 }
  0x10   : > { %s729_s24 = scalar_lea.vmem %s108_s23, 1024  ;;  %p737_p3 = scmp.lt.s32.totalorder %s108_s23, %s108_s23 }
  0x11   : > { %p673_p12 = pnand %p680_p9, %p672_p11  ;;  %p730_p0 = scmp.ne.s32.totalorder %s108_s23, %s729_s24 }
  0x12   : > { %p738_p4 = scmp.lt.s32.totalorder %s729_s24, %s729_s24 }
  0x13   : > { %p720_p13 = pneg %p673_p12 }
  0x14   : > { %p739_p6 = por %p738_p4, %p737_p3 }
  0x15   : > { %p732_p1 = pnand %p730_p0, %p720_p13 }
  0x17   : > { %p733_p2 = pneg %p732_p1 }
  0x19   : > { %p740_p7 = pnand %p739_p6, %p733_p2 }
  0x1b   : > { %743 = shalt.err (!%p740_p7)
}
  0x1c   : > { %675 = dma.hbm_to_vmem [thread:$0]  (!%p673_p12), %s1329_s1, 1024, %s108_s23, [#allocation3]  }
  0x1d   : > { %127 = sbr.rel (%p877_p10) target bundleno = 199 (0xc7), region = 28 }
  0x22   : > { %787 = dma.done.wait (%p680_p9), [#allocation3], 1024  }
  0x23   : > { %789 = vsyncadd (%p680_p9), [#allocation3], 4294966272  ;;  %p148_p8 = scmp.lt.s32.totalorder %s849_s13, 1  ;;  %v811_v0 = vmov 0   ;;  %v178_v3 = vlaneseq  ;;  %v901_v6 = vld [vmem:[#allocation2] ss:$2 sm:$0xff] }
  0x24   : > { %717 = vset.pattern.permute.xlu0 %v811_v0  ;;  %v913_v12 = vld [vmem:[#allocation2 + $0x1] ss:$2 sm:$0xff]  ;;  %v921_v16 = vld [vmem:[#allocation2 + $0x11] ss:$2 sm:$0xff]  ;;  %v975_v43 = vld [vmem:[#allocation2 + $0x10] ss:$2 sm:$0xff] }
  0x25   : > { %s149_s27 = scalar_select %p148_p8, %s849_s13, 1  ;;  %v179_v4 = vshrl.u32 %v178_v3, 7  ;;  %v939_v25 = vld [vmem:[#allocation2 + $0x21] ss:$2 sm:$0xff]  ;;  %v957_v34 = vld [vmem:[#allocation2 + $0x31] ss:$2 sm:$0xff] }
  0x26   : > { %s145_s4 = sand.u32 1, %s800_s10   ;;  %v994_v52 = vld [vmem:[#allocation2 + $0x20] ss:$2 sm:$0xff]  ;;  %v1012_v61 = vld [vmem:[#allocation2 + $0x30] ss:$2 sm:$0xff]  ;;  %s665_s7 = sshll.u32 %s849_s13, 12 }
  0x27   : > { %s659_s28 = sshll.u32 %s149_s27, 3  ;;  %v899_v5 = vsub.s32 0, %v179_v4  ;;  %v903_v7 = vsub.s32 1, %v179_v4  ;;  %v905_v8 = vsub.s32 2, %v179_v4  ;;  %v907_v9 = vsub.s32 3, %v179_v4  ;;  %s658_s5 = sshll.u32 %s145_s4, 8 }
  0x28   : > { %s151_s3 = scalar_lea.vmem %s1328_s0, %s659_s28  ;;  %v909_v10 = vsub.s32 4, %v179_v4  ;;  %v911_v11 = vsub.s32 5, %v179_v4  ;;  %v915_v13 = vsub.s32 6, %v179_v4  ;;  %v917_v14 = vsub.s32 7, %v179_v4  ;;  %s1123_s6 = scalar_lea.vmem [#allocation5], %s658_s5 }
  0x29   : > { %v152_v1 = vld [vmem:[%s151_s3] sm:$0xff]  ;;  %v345_v15 = vrot.slane %v901_v6, %v899_v5  ;;  %v349_v17 = vrot.slane %v901_v6, %v903_v7  ;;  %v353_v18 = vrot.slane %v901_v6, %v905_v8  ;;  %v357_v19 = vrot.slane %v901_v6, %v907_v9  ;;  %s581_s8 = sshll.u32 %s1123_s6, 4  ;;  %s1254_s16 = scalar_lea.hbm %s1330_s2, %s665_s7  ;;  %s1256_s8 = int_to_ptr.vmem [resolvable:$true] %s581_s8 }
  0x2a   : > { %vm168_vm0 = vcmp.gt.s32.totalorder %v152_v1, 0  ;;  %v361_v20 = vrot.slane %v901_v6, %v909_v10  ;;  %v181_v21 = vrot.slane %v913_v12, %v899_v5  ;;  %v185_v22 = vrot.slane %v913_v12, %v903_v7  ;;  %s567_s17 = scalar_lea.sflag [#allocation4], %s145_s4  ;;  %s744_s21 = scalar_lea.vmem %s1256_s8, 4096 }
  0x2b   : > { %v169_v2 = vsel %vm168_vm0, 1, %v811_v0  ;;  %v189_v23 = vrot.slane %v913_v12, %v905_v8  ;;  %v365_v24 = vrot.slane %v901_v6, %v911_v11  ;;  %v193_v26 = vrot.slane %v913_v12, %v907_v9  ;;  %p745_p6 = scmp.ne.s32.totalorder %s1256_s8, %s744_s21  ;;  %s812_s22 = smov [#allocation5]  }
  0x2c   : > { %171 = vperm.xlu0 %717, %v169_v2   ;;  %v197_v27 = vrot.slane %v913_v12, %v909_v10  ;;  %v201_v28 = vrot.slane %v913_v12, %v911_v11  ;;  %v205_v29 = vrot.slane %v913_v12, %v915_v13  ;;  %v209_v30 = vrot.slane %v913_v12, %v917_v14  ;;  %s748_s23 = sshll.u32 %s812_s22, 4  ;;  %s749_s23 = int_to_ptr.vmem [resolvable:$false] %s748_s23 }
  0x2d   : > { %v213_v31 = vrot.slane %v921_v16, %v899_v5  ;;  %v217_v32 = vrot.slane %v921_v16, %v903_v7  ;;  %v221_v33 = vrot.slane %v921_v16, %v905_v8  ;;  %v225_v35 = vrot.slane %v921_v16, %v907_v9  ;;  %p746_p9 = pnand %p745_p6, %p866_p5  ;;  %s750_s24 = scalar_lea.vmem %s749_s23, 8192 }
  0x2e   : > { %v229_v36 = vrot.slane %v921_v16, %v909_v10  ;;  %v233_v37 = vrot.slane %v921_v16, %v911_v11  ;;  %v237_v38 = vrot.slane %v921_v16, %v915_v13  ;;  %v369_v58 = vrot.slane %v901_v6, %v915_v13  ;;  %p751_p11 = scmp.lt.s32.totalorder %s1256_s8, %s749_s23  ;;  %p752_p12 = scmp.lt.s32.totalorder %s750_s24, %s744_s21 }
  0x2f   : > { %v373_v59 = vrot.slane %v901_v6, %v917_v14  ;;  %v377_v60 = vrot.slane %v975_v43, %v899_v5  ;;  %v381_v62 = vrot.slane %v975_v43, %v903_v7  ;;  %v385_v63 = vrot.slane %v975_v43, %v905_v8  ;;  %p747_p10 = pneg %p746_p9 }
  0x30   : > { %v389_v0 = vrot.slane %v975_v43, %v907_v9  ;;  %v393_v1 = vrot.slane %v975_v43, %v909_v10  ;;  %v397_v2 = vrot.slane %v975_v43, %v911_v11  ;;  %v401_v3 = vrot.slane %v975_v43, %v915_v13  ;;  %p753_p13 = por %p752_p12, %p751_p11 }
  0x31   : > { %v405_v4 = vrot.slane %v975_v43, %v917_v14  ;;  %v409_v57 = vrot.slane %v994_v52, %v899_v5  ;;  %v413_v56 = vrot.slane %v994_v52, %v903_v7  ;;  %v417_v55 = vrot.slane %v994_v52, %v905_v8 }
  0x32   : > { %v421_v54 = vrot.slane %v994_v52, %v907_v9  ;;  %v425_v53 = vrot.slane %v994_v52, %v909_v10  ;;  %v429_v51 = vrot.slane %v994_v52, %v911_v11  ;;  %v433_v43 = vrot.slane %v994_v52, %v915_v13  ;;  %p754_p0 = pnand %p753_p13, %p747_p10 }
  0x33   : > { %v437_v50 = vrot.slane %v994_v52, %v917_v14  ;;  %v441_v49 = vrot.slane %v1012_v61, %v899_v5  ;;  %v445_v47 = vrot.slane %v1012_v61, %v903_v7  ;;  %v449_v46 = vrot.slane %v1012_v61, %v905_v8 }
  0x34   : > { %v453_v45 = vrot.slane %v1012_v61, %v907_v9  ;;  %v461_v52 = vrot.slane %v1012_v61, %v911_v11  ;;  %v465_v42 = vrot.slane %v1012_v61, %v915_v13  ;;  %v469_v41 = vrot.slane %v1012_v61, %v917_v14 }
  0xa7   : > { %v1048_v48 = vpop.permute.xlu0 %171 }
  0xa8   : > { %vm173_vm1 = vcmp.eq.s32.totalorder %v1048_v48, 1 }
  0xa9   : > { %v502_v44 = vsel %vm173_vm1, %v181_v21, %v345_v15  ;;  %v503_v40 = vsel %vm173_vm1, %v185_v22, %v349_v17  ;;  %v504_v39 = vsel %vm173_vm1, %v189_v23, %v353_v18  ;;  %v505_v15 = vsel %vm173_vm1, %v193_v26, %v357_v19 }
  0xaa   : > { %v506_v17 = vsel %vm173_vm1, %v197_v27, %v361_v20  ;;  %v507_v18 = vsel %vm173_vm1, %v201_v28, %v365_v24  ;;  %v508_v19 = vsel %vm173_vm1, %v205_v29, %v369_v58  ;;  %v509_v20 = vsel %vm173_vm1, %v209_v30, %v373_v59  ;;  %534 = vst [vmem:[%s1123_s6] sm:$0xff] %v502_v44 }
  0xab   : > { %535 = vst [vmem:[%s1123_s6 + $0x8] sm:$0xff] %v503_v40  ;;  %536 = vst [vmem:[%s1123_s6 + $0x10] sm:$0xff] %v504_v39  ;;  %v510_v6 = vsel %vm173_vm1, %v213_v31, %v377_v60  ;;  %v511_v12 = vsel %vm173_vm1, %v217_v32, %v381_v62  ;;  %v512_v21 = vsel %vm173_vm1, %v221_v33, %v385_v63 }
  0xac   : > { %537 = vst [vmem:[%s1123_s6 + $0x18] sm:$0xff] %v505_v15  ;;  %v513_v22 = vsel %vm173_vm1, %v225_v35, %v389_v0  ;;  %538 = vst [vmem:[%s1123_s6 + $0x20] sm:$0xff] %v506_v17  ;;  %v514_v23 = vsel %vm173_vm1, %v229_v36, %v393_v1  ;;  %v515_v24 = vsel %vm173_vm1, %v233_v37, %v397_v2 }
  0xad   : > { %539 = vst [vmem:[%s1123_s6 + $0x28] sm:$0xff] %v507_v18  ;;  %540 = vst [vmem:[%s1123_s6 + $0x30] sm:$0xff] %v508_v19  ;;  %v516_v26 = vsel %vm173_vm1, %v237_v38, %v401_v3  ;;  %v1334_v27 = vrot.slane %v921_v16, %v917_v14  ;;  %v1335_v29 = vrot.slane %v939_v25, %v899_v5 }
  0xae   : > { %541 = vst [vmem:[%s1123_s6 + $0x38] sm:$0xff] %v509_v20  ;;  %542 = vst [vmem:[%s1123_s6 + $0x40] sm:$0xff] %v510_v6  ;;  %v1336_v16 = vrot.slane %v939_v25, %v903_v7  ;;  %v1337_v32 = vrot.slane %v939_v25, %v905_v8  ;;  %v1338_v35 = vrot.slane %v939_v25, %v907_v9 }
  0xaf   : > { %v517_v28 = vsel %vm173_vm1, %v1334_v27, %v405_v4  ;;  %543 = vst [vmem:[%s1123_s6 + $0x48] sm:$0xff] %v511_v12  ;;  %544 = vst [vmem:[%s1123_s6 + $0x50] sm:$0xff] %v512_v21  ;;  %v518_v30 = vsel %vm173_vm1, %v1335_v29, %v409_v57  ;;  %v1339_v37 = vrot.slane %v939_v25, %v909_v10 }
  0xb0   : > { %545 = vst [vmem:[%s1123_s6 + $0x58] sm:$0xff] %v513_v22  ;;  %v519_v31 = vsel %vm173_vm1, %v1336_v16, %v413_v56  ;;  %v520_v33 = vsel %vm173_vm1, %v1337_v32, %v417_v55  ;;  %v521_v36 = vsel %vm173_vm1, %v1338_v35, %v421_v54  ;;  %546 = vst [vmem:[%s1123_s6 + $0x60] sm:$0xff] %v514_v23 }
  0xb1   : > { %547 = vst [vmem:[%s1123_s6 + $0x68] sm:$0xff] %v515_v24  ;;  %548 = vst [vmem:[%s1123_s6 + $0x70] sm:$0xff] %v516_v26  ;;  %v522_v38 = vsel %vm173_vm1, %v1339_v37, %v425_v53  ;;  %v1340_v39 = vrot.slane %v939_v25, %v911_v11  ;;  %v1341_v44 = vrot.slane %v939_v25, %v915_v13 }
  0xb2   : > { %549 = vst [vmem:[%s1123_s6 + $0x78] sm:$0xff] %v517_v28  ;;  %v1342_v55 = vrot.slane %v939_v25, %v917_v14  ;;  %550 = vst [vmem:[%s1123_s6 + $0x80] sm:$0xff] %v518_v30  ;;  %v1344_v57 = vrot.slane %v957_v34, %v903_v7  ;;  %v1347_v7 = vrot.slane %v1012_v61, %v909_v10 }
  0xb3   : > { %v523_v40 = vsel %vm173_vm1, %v1340_v39, %v429_v51  ;;  %v524_v54 = vsel %vm173_vm1, %v1341_v44, %v433_v43  ;;  %551 = vst [vmem:[%s1123_s6 + $0x88] sm:$0xff] %v519_v31  ;;  %552 = vst [vmem:[%s1123_s6 + $0x90] sm:$0xff] %v520_v33  ;;  %v1343_v51 = vrot.slane %v957_v34, %v899_v5 }
  0xb4   : > { %v525_v56 = vsel %vm173_vm1, %v1342_v55, %v437_v50  ;;  %553 = vst [vmem:[%s1123_s6 + $0x98] sm:$0xff] %v521_v36  ;;  %v527_v25 = vsel %vm173_vm1, %v1344_v57, %v445_v47  ;;  %v1345_v50 = vrot.slane %v957_v34, %v905_v8  ;;  %v1346_v5 = vrot.slane %v957_v34, %v907_v9 }
  0xb5   : > { %v526_v53 = vsel %vm173_vm1, %v1343_v51, %v441_v49  ;;  %554 = vst [vmem:[%s1123_s6 + $0xa0] sm:$0xff] %v522_v38  ;;  %555 = vst [vmem:[%s1123_s6 + $0xa8] sm:$0xff] %v523_v40  ;;  %v1348_v8 = vrot.slane %v957_v34, %v909_v10  ;;  %v1350_v47 = vrot.slane %v957_v34, %v915_v13 }
  0xb6   : > { %v528_v58 = vsel %vm173_vm1, %v1345_v50, %v449_v46  ;;  %v529_v49 = vsel %vm173_vm1, %v1346_v5, %v453_v45  ;;  %556 = vst [vmem:[%s1123_s6 + $0xb0] sm:$0xff] %v524_v54  ;;  %557 = vst [vmem:[%s1123_s6 + $0xb8] sm:$0xff] %v525_v56  ;;  %v1349_v45 = vrot.slane %v957_v34, %v911_v11 }
  0xb7   : > { %v530_v9 = vsel %vm173_vm1, %v1348_v8, %v1347_v7  ;;  %v532_v59 = vsel %vm173_vm1, %v1350_v47, %v465_v42  ;;  %v1351_v10 = vrot.slane %v957_v34, %v917_v14  ;;  %558 = vst [vmem:[%s1123_s6 + $0xc0] sm:$0xff] %v526_v53  ;;  %559 = vst [vmem:[%s1123_s6 + $0xc8] sm:$0xff] %v527_v25 }
  0xb8   : > { %v531_v46 = vsel %vm173_vm1, %v1349_v45, %v461_v52  ;;  %560 = vst [vmem:[%s1123_s6 + $0xd0] sm:$0xff] %v528_v58  ;;  %561 = vst [vmem:[%s1123_s6 + $0xd8] sm:$0xff] %v529_v49 }
  0xb9   : > { %v533_v60 = vsel %vm173_vm1, %v1351_v10, %v469_v41  ;;  %562 = vst [vmem:[%s1123_s6 + $0xe0] sm:$0xff] %v530_v9  ;;  %563 = vst [vmem:[%s1123_s6 + $0xe8] sm:$0xff] %v531_v46 }
  0xba   : > { %564 = vst [vmem:[%s1123_s6 + $0xf0] sm:$0xff] %v532_v59  ;;  %565 = vst [vmem:[%s1123_s6 + $0xf8] sm:$0xff] %v533_v60 }
  0xbb   : > { %757 = shalt.err (!%p754_p0)
}
  0xbc   : > { %s758_s25 = scalar_lea.hbm %s1254_s16, 4096  ;;  %s762_s28 = scalar_lea.hbm %s1330_s2, 8192 }
  0xbd   : > { %p759_p1 = scmp.ne.s32.totalorder %s1254_s16, %s758_s25  ;;  %p763_p4 = scmp.lt.s32.totalorder %s1254_s16, %s1330_s2 }
  0xbe   : > { %p764_p7 = scmp.lt.s32.totalorder %s762_s28, %s758_s25 }
  0xbf   : > { %p760_p2 = pnand %p759_p1, %p866_p5 }
  0xc0   : > { %p765_p8 = por %p764_p7, %p763_p4 }
  0xc1   : > { %p761_p3 = pneg %p760_p2 }
  0xc3   : > { %p766_p6 = pnand %p765_p8, %p761_p3 }
  0xc5   : > { %769 = shalt.err (!%p766_p6)
}
  0xc6   : > { %670 = dma.vmem_to_hbm [thread:$0]  (%p866_p5), %s1256_s8, 4096, %s1254_s16, %s567_s17  }
  0xc7 PF: > { %p682_p9 = scmp.ge.s32.totalorder %s808_s12, 2  ;;  %s593_s3 = sand.u32 1, %s796_s9  }
  0xc8   : > { %p1352_p10 = scmp.ne.s32.totalorder %s1332_s20, 0  ;;  %s594_s4 = scalar_lea.sflag [#allocation4], %s593_s3 }
  0xca   : > { %p677_p11 = pnand %p682_p9, %p1352_p10 }
  0xcc   : > { %p678_p12 = pneg %p677_p11 }
  0xce   : > { %791 = dma.done.wait (%p678_p12), %s594_s4, 4096  }
  0xcf   : > { %793 = vsyncadd (%p678_p12), %s594_s4, 4294963200  ;;  %p13_p13 = scmp.ge.s32.totalorder %s853_s15, 4   ;;  %s1353_s9 = smov %s800_s10 }
  0xd0   : > { %s1354_s10 = smov %s804_s11  ;;  %s1355_s11 = smov %s864_s18 }
  0xd1   : > { %s1356_s12 = smov %s853_s15  ;;  %15 = sbr.rel (!%p13_p13) target bundleno = 4 (0x4), region = 75 }
  0xd6   :  { %599 = vsyncpa [#allocation3], 1 }
  0xd7   :  { %601 = vsyncpa [#allocation3 + $0x1], 1 }
  0xd8   :  { %602 = vsyncpa [#allocation4], 1 }
  0xd9   :  { %604 = vsyncpa [#allocation4 + $0x1], 1 }

</bundles_post_ra>
